<compile_context>
chip_gen: v6e
topology: v6e:2x2x1
jax: 0.10.0
libtpu: 0.0.40
codegen_flags: <defaults>
</compile_context>

<pallas_src>
import functools

import jax
import jax.numpy as jnp
from jax import lax
from jax.experimental import pallas as pl
from jax.experimental.pallas import tpu as pltpu


def _round_up(x, m):
    return (x + m - 1) // m * m


def _sepconv_kernel(x_ref, dw_ref, pw_ref, o_ref, xpad_ref, *,
                    k, p, h, w, wp, acc_len, c):
    # x_ref   : (1, C, H, W)       one batch element, raw NCHW (no HBM pad)
    # dw_ref  : (k*k, C, 1)        depthwise taps as per-channel columns
    # pw_ref  : (C_in, C_out, 1)   pointwise weight columns
    # o_ref   : (1, C, acc_len)    lane-dense output slab (row stride = Wp)
    # xpad_ref: (C, scr_len) f32   flat zero-padded image, row stride = Wp

    # ---- in-kernel zero padding into the flat, lane-dense scratch ---------
    xpad_ref[...] = jnp.zeros_like(xpad_ref)
    for r in range(h):  # H small (C, W) row copies; cast once on the way in
        xpad_ref[:, pl.ds((r + p) * wp + p, w)] = (
            x_ref[0, :, r, :].astype(xpad_ref.dtype))

    # ---- depthwise conv: k*k lane-dense taps with per-channel scale -------
    # win[ci, i*Wp + j] = padded_x[ci, i + di, j + dj]; valid output positions
    # are q = i*Wp + j with j < Wout (the k-1 junk columns per row are sliced
    # away in the wrapper).
    acc = jnp.zeros((c, acc_len), jnp.float32)
    for di in range(k):
        for dj in range(k):
            win = xpad_ref[:, pl.ds(di * wp + dj, acc_len)]    # (C, acc_len)
            acc = acc + win * dw_ref[di * k + dj]              # (C,1) lane bcast

    # ---- pointwise 1x1 conv ------------------------------------------------
    if c <= 32:
        # Small C: unroll as C_in VPU FMAs on lane-dense tiles (skip the MXU).
        out = jnp.zeros((c, acc_len), jnp.float32)
        for ci in range(c):
            out = out + pw_ref[ci] * acc[ci:ci + 1, :]         # (C,1)*(1,L)
    else:
        # Large C: contract channels on the MXU instead.
        out = lax.dot_general(pw_ref[...][:, :, 0], acc,
                              (((0,), (0,)), ((), ())),
                              preferred_element_type=jnp.float32)

    o_ref[0] = out.astype(o_ref.dtype)


def dynamic_size_separable_conv2d(x_nchw, dw, pw, *, kernel_size, padding):
    """x_nchw: (N, C, H, W); dw: (C, 1, k, k); pw: (C, C, 1, 1) -> (N, C, Hout, Wout)."""
    n, c, h, w = x_nchw.shape
    k, p = kernel_size, padding
    hp, wp = h + 2 * p, w + 2 * p
    h_out, w_out = hp - k + 1, wp - k + 1
    assert h_out > 0 and w_out > 0

    # Output slab length (row stride = wp), rounded to 128 lanes -> unmasked vst.
    acc_len = _round_up(h_out * wp, 128)
    max_shift = (k - 1) * (wp + 1)
    scr_len = _round_up(max_shift + acc_len, 128)

    # Tiny one-time weight re-layouts (k*k*C and C*C elements).
    dw_taps = jnp.transpose(dw[:, 0, :, :].reshape(c, k * k), (1, 0))[:, :, None]
    pw_cols = jnp.transpose(pw[:, :, 0, 0], (1, 0))[:, :, None]

    kernel = functools.partial(_sepconv_kernel, k=k, p=p, h=h, w=w, wp=wp,
                               acc_len=acc_len, c=c)

    # TODO(synk): for production image sizes add an H-row tile axis to the grid
    # (k-1 row halo in the input index_map) so blocks stay within v7x's 64 MiB
    # VMEM and both TensorCores get a parallel axis; per-batch blocks suffice
    # at these shapes.
    out_flat = pl.pallas_call(
        kernel,
        out_shape=jax.ShapeDtypeStruct((n, c, acc_len), x_nchw.dtype),
        grid_spec=pltpu.PrefetchScalarGridSpec(
            num_scalar_prefetch=0,
            grid=(n,),
            in_specs=[
                pl.BlockSpec((1, c, h, w), lambda b: (b, 0, 0, 0)),
                pl.BlockSpec((k * k, c, 1), lambda b: (0, 0, 0)),
                pl.BlockSpec((c, c, 1), lambda b: (0, 0, 0)),
            ],
            out_specs=pl.BlockSpec((1, c, acc_len), lambda b: (b, 0, 0)),
            scratch_shapes=[pltpu.VMEM((c, scr_len), jnp.float32)],
        ),
        compiler_params=pltpu.CompilerParams(
            dimension_semantics=("parallel",)),
    )(x_nchw, dw_taps, pw_cols)

    # Free reshape + cheap slice: drop the per-row (k-1) junk columns and the
    # 128-lane padding; no transposes anywhere in the wrapper.
    out = out_flat[:, :, :h_out * wp].reshape(n, c, h_out, wp)[:, :, :, :w_out]
    return out


def _reference(x_nchw, dw, pw, *, padding):
    c = x_nchw.shape[1]
    depthwise = lax.conv_general_dilated(
        x_nchw, dw, window_strides=(1, 1),
        padding=[(padding, padding), (padding, padding)],
        dimension_numbers=("NCHW", "OIHW", "NCHW"),
        feature_group_count=c)
    return lax.conv_general_dilated(
        depthwise, pw, window_strides=(1, 1), padding="VALID",
        dimension_numbers=("NCHW", "OIHW", "NCHW"))


if __name__ == "__main__":
    key = jax.random.PRNGKey(0)
    k_x, k_dw, k_pw = jax.random.split(key, 3)

    N, C, H, W = 2, 4, 16, 16
    kernel_size, padding = 3, 1

    x = jax.random.normal(k_x, (N, C, H, W), dtype=jnp.float32)
    # Shapes match the torch.randn calls inside forward():
    dw = jax.random.normal(k_dw, (C, 1, kernel_size, kernel_size), jnp.float32)
    pw = jax.random.normal(k_pw, (C, C, 1, 1), jnp.float32)

    out = dynamic_size_separable_conv2d(
        x, dw, pw, kernel_size=kernel_size, padding=padding)
    out = jax.block_until_ready(out)

    ref = _reference(x, dw, pw, padding=padding)
    assert out.shape == ref.shape, (out.shape, ref.shape)
    assert jnp.allclose(out, ref, rtol=1e-4, atol=1e-4), "mismatch vs reference"

    print("KERNEL_OK")
</pallas_src>

<mosaic_0001>
module attributes {stable_mosaic.version = 11 : i64} {
  func.func @_sepconv_kernel(%arg0: i32, %arg1: memref<1x4x16x16xf32, #tpu.memory_space<vmem>>, %arg2: memref<9x4x1xf32, #tpu.memory_space<vmem>>, %arg3: memref<4x4x1xf32, #tpu.memory_space<vmem>>, %arg4: memref<1x4x384xf32, #tpu.memory_space<vmem>>, %arg5: memref<4x512xf32, #tpu.memory_space<vmem>>) attributes {dimension_semantics = [#tpu.dimension_semantics<parallel>], iteration_bounds = array<i64: 2>, scalar_prefetch = 0 : i64, scratch_operands = 1 : i64, tpu.core_type = #tpu.core_type<tc>, window_params = [{transform_indices = @transform_0, window_bounds = array<i64: 1, 4, 16, 16>}, {pipeline_mode = #tpu.pipeline_mode<synchronous>, transform_indices = @transform_1, window_bounds = array<i64: 9, 4, 1>}, {pipeline_mode = #tpu.pipeline_mode<synchronous>, transform_indices = @transform_2, window_bounds = array<i64: 4, 4, 1>}, {transform_indices = @transform_3, window_bounds = array<i64: 1, 4, 384>}]} {
    %cst = arith.constant 0.000000e+00 : f32
    %0 = vector.broadcast %cst : f32 to vector<4x512xf32>
    %c0 = arith.constant 0 : index
    %c0_0 = arith.constant 0 : index
    %1 = vector.load %arg5[%c0, %c0_0] : memref<4x512xf32, #tpu.memory_space<vmem>>, vector<4x512xf32>
    tpu.vector_store %arg5[%c0, %c0_0], %0 {strides = array<i32>} : memref<4x512xf32, #tpu.memory_space<vmem>>, vector<4x512xf32>,
    %c0_1 = arith.constant 0 : index
    %c0_2 = arith.constant 0 : index
    %c0_3 = arith.constant 0 : index
    %c0_4 = arith.constant 0 : index
    %2 = vector.load %arg1[%c0_1, %c0_2, %c0_3, %c0_4] : memref<1x4x16x16xf32, #tpu.memory_space<vmem>>, vector<1x4x1x16xf32>
    %3 = vector.shape_cast %2 : vector<1x4x1x16xf32> to vector<4x16xf32>
    %c0_5 = arith.constant 0 : index
    %c19 = arith.constant 19 : index
    %4 = vector.load %arg5[%c0_5, %c19] : memref<4x512xf32, #tpu.memory_space<vmem>>, vector<4x16xf32>
    tpu.vector_store %arg5[%c0_5, %c19], %3 {strides = array<i32>} : memref<4x512xf32, #tpu.memory_space<vmem>>, vector<4x16xf32>,
    %c0_6 = arith.constant 0 : index
    %c0_7 = arith.constant 0 : index
    %c1 = arith.constant 1 : index
    %c0_8 = arith.constant 0 : index
    %5 = vector.load %arg1[%c0_6, %c0_7, %c1, %c0_8] : memref<1x4x16x16xf32, #tpu.memory_space<vmem>>, vector<1x4x1x16xf32>
    %6 = vector.shape_cast %5 : vector<1x4x1x16xf32> to vector<4x16xf32>
    %c0_9 = arith.constant 0 : index
    %c37 = arith.constant 37 : index
    %7 = vector.load %arg5[%c0_9, %c37] : memref<4x512xf32, #tpu.memory_space<vmem>>, vector<4x16xf32>
    tpu.vector_store %arg5[%c0_9, %c37], %6 {strides = array<i32>} : memref<4x512xf32, #tpu.memory_space<vmem>>, vector<4x16xf32>,
    %c0_10 = arith.constant 0 : index
    %c0_11 = arith.constant 0 : index
    %c2 = arith.constant 2 : index
    %c0_12 = arith.constant 0 : index
    %8 = vector.load %arg1[%c0_10, %c0_11, %c2, %c0_12] : memref<1x4x16x16xf32, #tpu.memory_space<vmem>>, vector<1x4x1x16xf32>
    %9 = vector.shape_cast %8 : vector<1x4x1x16xf32> to vector<4x16xf32>
    %c0_13 = arith.constant 0 : index
    %c55 = arith.constant 55 : index
    %10 = vector.load %arg5[%c0_13, %c55] : memref<4x512xf32, #tpu.memory_space<vmem>>, vector<4x16xf32>
    tpu.vector_store %arg5[%c0_13, %c55], %9 {strides = array<i32>} : memref<4x512xf32, #tpu.memory_space<vmem>>, vector<4x16xf32>,
    %c0_14 = arith.constant 0 : index
    %c0_15 = arith.constant 0 : index
    %c3 = arith.constant 3 : index
    %c0_16 = arith.constant 0 : index
    %11 = vector.load %arg1[%c0_14, %c0_15, %c3, %c0_16] : memref<1x4x16x16xf32, #tpu.memory_space<vmem>>, vector<1x4x1x16xf32>
    %12 = vector.shape_cast %11 : vector<1x4x1x16xf32> to vector<4x16xf32>
    %c0_17 = arith.constant 0 : index
    %c73 = arith.constant 73 : index
    %13 = vector.load %arg5[%c0_17, %c73] : memref<4x512xf32, #tpu.memory_space<vmem>>, vector<4x16xf32>
    tpu.vector_store %arg5[%c0_17, %c73], %12 {strides = array<i32>} : memref<4x512xf32, #tpu.memory_space<vmem>>, vector<4x16xf32>,
    %c0_18 = arith.constant 0 : index
    %c0_19 = arith.constant 0 : index
    %c4 = arith.constant 4 : index
    %c0_20 = arith.constant 0 : index
    %14 = vector.load %arg1[%c0_18, %c0_19, %c4, %c0_20] : memref<1x4x16x16xf32, #tpu.memory_space<vmem>>, vector<1x4x1x16xf32>
    %15 = vector.shape_cast %14 : vector<1x4x1x16xf32> to vector<4x16xf32>
    %c0_21 = arith.constant 0 : index
    %c91 = arith.constant 91 : index
    %16 = vector.load %arg5[%c0_21, %c91] : memref<4x512xf32, #tpu.memory_space<vmem>>, vector<4x16xf32>
    tpu.vector_store %arg5[%c0_21, %c91], %15 {strides = array<i32>} : memref<4x512xf32, #tpu.memory_space<vmem>>, vector<4x16xf32>,
    %c0_22 = arith.constant 0 : index
    %c0_23 = arith.constant 0 : index
    %c5 = arith.constant 5 : index
    %c0_24 = arith.constant 0 : index
    %17 = vector.load %arg1[%c0_22, %c0_23, %c5, %c0_24] : memref<1x4x16x16xf32, #tpu.memory_space<vmem>>, vector<1x4x1x16xf32>
    %18 = vector.shape_cast %17 : vector<1x4x1x16xf32> to vector<4x16xf32>
    %c0_25 = arith.constant 0 : index
    %c109 = arith.constant 109 : index
    %19 = vector.load %arg5[%c0_25, %c109] : memref<4x512xf32, #tpu.memory_space<vmem>>, vector<4x16xf32>
    tpu.vector_store %arg5[%c0_25, %c109], %18 {strides = array<i32>} : memref<4x512xf32, #tpu.memory_space<vmem>>, vector<4x16xf32>,
    %c0_26 = arith.constant 0 : index
    %c0_27 = arith.constant 0 : index
    %c6 = arith.constant 6 : index
    %c0_28 = arith.constant 0 : index
    %20 = vector.load %arg1[%c0_26, %c0_27, %c6, %c0_28] : memref<1x4x16x16xf32, #tpu.memory_space<vmem>>, vector<1x4x1x16xf32>
    %21 = vector.shape_cast %20 : vector<1x4x1x16xf32> to vector<4x16xf32>
    %c0_29 = arith.constant 0 : index
    %c127 = arith.constant 127 : index
    %22 = vector.load %arg5[%c0_29, %c127] : memref<4x512xf32, #tpu.memory_space<vmem>>, vector<4x16xf32>
    tpu.vector_store %arg5[%c0_29, %c127], %21 {strides = array<i32>} : memref<4x512xf32, #tpu.memory_space<vmem>>, vector<4x16xf32>,
    %c0_30 = arith.constant 0 : index
    %c0_31 = arith.constant 0 : index
    %c7 = arith.constant 7 : index
    %c0_32 = arith.constant 0 : index
    %23 = vector.load %arg1[%c0_30, %c0_31, %c7, %c0_32] : memref<1x4x16x16xf32, #tpu.memory_space<vmem>>, vector<1x4x1x16xf32>
    %24 = vector.shape_cast %23 : vector<1x4x1x16xf32> to vector<4x16xf32>
    %c0_33 = arith.constant 0 : index
    %c145 = arith.constant 145 : index
    %25 = vector.load %arg5[%c0_33, %c145] : memref<4x512xf32, #tpu.memory_space<vmem>>, vector<4x16xf32>
    tpu.vector_store %arg5[%c0_33, %c145], %24 {strides = array<i32>} : memref<4x512xf32, #tpu.memory_space<vmem>>, vector<4x16xf32>,
    %c0_34 = arith.constant 0 : index
    %c0_35 = arith.constant 0 : index
    %c8 = arith.constant 8 : index
    %c0_36 = arith.constant 0 : index
    %26 = vector.load %arg1[%c0_34, %c0_35, %c8, %c0_36] : memref<1x4x16x16xf32, #tpu.memory_space<vmem>>, vector<1x4x1x16xf32>
    %27 = vector.shape_cast %26 : vector<1x4x1x16xf32> to vector<4x16xf32>
    %c0_37 = arith.constant 0 : index
    %c163 = arith.constant 163 : index
    %28 = vector.load %arg5[%c0_37, %c163] : memref<4x512xf32, #tpu.memory_space<vmem>>, vector<4x16xf32>
    tpu.vector_store %arg5[%c0_37, %c163], %27 {strides = array<i32>} : memref<4x512xf32, #tpu.memory_space<vmem>>, vector<4x16xf32>,
    %c0_38 = arith.constant 0 : index
    %c0_39 = arith.constant 0 : index
    %c9 = arith.constant 9 : index
    %c0_40 = arith.constant 0 : index
    %29 = vector.load %arg1[%c0_38, %c0_39, %c9, %c0_40] : memref<1x4x16x16xf32, #tpu.memory_space<vmem>>, vector<1x4x1x16xf32>
    %30 = vector.shape_cast %29 : vector<1x4x1x16xf32> to vector<4x16xf32>
    %c0_41 = arith.constant 0 : index
    %c181 = arith.constant 181 : index
    %31 = vector.load %arg5[%c0_41, %c181] : memref<4x512xf32, #tpu.memory_space<vmem>>, vector<4x16xf32>
    tpu.vector_store %arg5[%c0_41, %c181], %30 {strides = array<i32>} : memref<4x512xf32, #tpu.memory_space<vmem>>, vector<4x16xf32>,
    %c0_42 = arith.constant 0 : index
    %c0_43 = arith.constant 0 : index
    %c10 = arith.constant 10 : index
    %c0_44 = arith.constant 0 : index
    %32 = vector.load %arg1[%c0_42, %c0_43, %c10, %c0_44] : memref<1x4x16x16xf32, #tpu.memory_space<vmem>>, vector<1x4x1x16xf32>
    %33 = vector.shape_cast %32 : vector<1x4x1x16xf32> to vector<4x16xf32>
    %c0_45 = arith.constant 0 : index
    %c199 = arith.constant 199 : index
    %34 = vector.load %arg5[%c0_45, %c199] : memref<4x512xf32, #tpu.memory_space<vmem>>, vector<4x16xf32>
    tpu.vector_store %arg5[%c0_45, %c199], %33 {strides = array<i32>} : memref<4x512xf32, #tpu.memory_space<vmem>>, vector<4x16xf32>,
    %c0_46 = arith.constant 0 : index
    %c0_47 = arith.constant 0 : index
    %c11 = arith.constant 11 : index
    %c0_48 = arith.constant 0 : index
    %35 = vector.load %arg1[%c0_46, %c0_47, %c11, %c0_48] : memref<1x4x16x16xf32, #tpu.memory_space<vmem>>, vector<1x4x1x16xf32>
    %36 = vector.shape_cast %35 : vector<1x4x1x16xf32> to vector<4x16xf32>
    %c0_49 = arith.constant 0 : index
    %c217 = arith.constant 217 : index
    %37 = vector.load %arg5[%c0_49, %c217] : memref<4x512xf32, #tpu.memory_space<vmem>>, vector<4x16xf32>
    tpu.vector_store %arg5[%c0_49, %c217], %36 {strides = array<i32>} : memref<4x512xf32, #tpu.memory_space<vmem>>, vector<4x16xf32>,
    %c0_50 = arith.constant 0 : index
    %c0_51 = arith.constant 0 : index
    %c12 = arith.constant 12 : index
    %c0_52 = arith.constant 0 : index
    %38 = vector.load %arg1[%c0_50, %c0_51, %c12, %c0_52] : memref<1x4x16x16xf32, #tpu.memory_space<vmem>>, vector<1x4x1x16xf32>
    %39 = vector.shape_cast %38 : vector<1x4x1x16xf32> to vector<4x16xf32>
    %c0_53 = arith.constant 0 : index
    %c235 = arith.constant 235 : index
    %40 = vector.load %arg5[%c0_53, %c235] : memref<4x512xf32, #tpu.memory_space<vmem>>, vector<4x16xf32>
    tpu.vector_store %arg5[%c0_53, %c235], %39 {strides = array<i32>} : memref<4x512xf32, #tpu.memory_space<vmem>>, vector<4x16xf32>,
    %c0_54 = arith.constant 0 : index
    %c0_55 = arith.constant 0 : index
    %c13 = arith.constant 13 : index
    %c0_56 = arith.constant 0 : index
    %41 = vector.load %arg1[%c0_54, %c0_55, %c13, %c0_56] : memref<1x4x16x16xf32, #tpu.memory_space<vmem>>, vector<1x4x1x16xf32>
    %42 = vector.shape_cast %41 : vector<1x4x1x16xf32> to vector<4x16xf32>
    %c0_57 = arith.constant 0 : index
    %c253 = arith.constant 253 : index
    %43 = vector.load %arg5[%c0_57, %c253] : memref<4x512xf32, #tpu.memory_space<vmem>>, vector<4x16xf32>
    tpu.vector_store %arg5[%c0_57, %c253], %42 {strides = array<i32>} : memref<4x512xf32, #tpu.memory_space<vmem>>, vector<4x16xf32>,
    %c0_58 = arith.constant 0 : index
    %c0_59 = arith.constant 0 : index
    %c14 = arith.constant 14 : index
    %c0_60 = arith.constant 0 : index
    %44 = vector.load %arg1[%c0_58, %c0_59, %c14, %c0_60] : memref<1x4x16x16xf32, #tpu.memory_space<vmem>>, vector<1x4x1x16xf32>
    %45 = vector.shape_cast %44 : vector<1x4x1x16xf32> to vector<4x16xf32>
    %c0_61 = arith.constant 0 : index
    %c271 = arith.constant 271 : index
    %46 = vector.load %arg5[%c0_61, %c271] : memref<4x512xf32, #tpu.memory_space<vmem>>, vector<4x16xf32>
    tpu.vector_store %arg5[%c0_61, %c271], %45 {strides = array<i32>} : memref<4x512xf32, #tpu.memory_space<vmem>>, vector<4x16xf32>,
    %c0_62 = arith.constant 0 : index
    %c0_63 = arith.constant 0 : index
    %c15 = arith.constant 15 : index
    %c0_64 = arith.constant 0 : index
    %47 = vector.load %arg1[%c0_62, %c0_63, %c15, %c0_64] : memref<1x4x16x16xf32, #tpu.memory_space<vmem>>, vector<1x4x1x16xf32>
    %48 = vector.shape_cast %47 : vector<1x4x1x16xf32> to vector<4x16xf32>
    %c0_65 = arith.constant 0 : index
    %c289 = arith.constant 289 : index
    %49 = vector.load %arg5[%c0_65, %c289] : memref<4x512xf32, #tpu.memory_space<vmem>>, vector<4x16xf32>
    tpu.vector_store %arg5[%c0_65, %c289], %48 {strides = array<i32>} : memref<4x512xf32, #tpu.memory_space<vmem>>, vector<4x16xf32>,
    %cst_66 = arith.constant 0.000000e+00 : f32
    %50 = vector.broadcast %cst_66 : f32 to vector<4x384xf32>
    %c0_67 = arith.constant 0 : index
    %c0_68 = arith.constant 0 : index
    %51 = vector.load %arg5[%c0_67, %c0_68] : memref<4x512xf32, #tpu.memory_space<vmem>>, vector<4x384xf32>
    %c0_69 = arith.constant 0 : index
    %c0_70 = arith.constant 0 : index
    %c0_71 = arith.constant 0 : index
    %52 = vector.load %arg2[%c0_69, %c0_70, %c0_71] : memref<9x4x1xf32, #tpu.memory_space<vmem>>, vector<1x4x1xf32>
    %53 = vector.shape_cast %52 : vector<1x4x1xf32> to vector<4x1xf32>
    %54 = vector.broadcast %53 : vector<4x1xf32> to vector<4x384xf32>
    %55 = arith.mulf %51, %54 : vector<4x384xf32>
    %56 = arith.addf %50, %55 : vector<4x384xf32>
    %c0_72 = arith.constant 0 : index
    %c1_73 = arith.constant 1 : index
    %57 = vector.load %arg5[%c0_72, %c1_73] : memref<4x512xf32, #tpu.memory_space<vmem>>, vector<4x384xf32>
    %c1_74 = arith.constant 1 : index
    %c0_75 = arith.constant 0 : index
    %c0_76 = arith.constant 0 : index
    %58 = vector.load %arg2[%c1_74, %c0_75, %c0_76] : memref<9x4x1xf32, #tpu.memory_space<vmem>>, vector<1x4x1xf32>
    %59 = vector.shape_cast %58 : vector<1x4x1xf32> to vector<4x1xf32>
    %60 = vector.broadcast %59 : vector<4x1xf32> to vector<4x384xf32>
    %61 = arith.mulf %57, %60 : vector<4x384xf32>
    %62 = arith.addf %56, %61 : vector<4x384xf32>
    %c0_77 = arith.constant 0 : index
    %c2_78 = arith.constant 2 : index
    %63 = vector.load %arg5[%c0_77, %c2_78] : memref<4x512xf32, #tpu.memory_space<vmem>>, vector<4x384xf32>
    %c2_79 = arith.constant 2 : index
    %c0_80 = arith.constant 0 : index
    %c0_81 = arith.constant 0 : index
    %64 = vector.load %arg2[%c2_79, %c0_80, %c0_81] : memref<9x4x1xf32, #tpu.memory_space<vmem>>, vector<1x4x1xf32>
    %65 = vector.shape_cast %64 : vector<1x4x1xf32> to vector<4x1xf32>
    %66 = vector.broadcast %65 : vector<4x1xf32> to vector<4x384xf32>
    %67 = arith.mulf %63, %66 : vector<4x384xf32>
    %68 = arith.addf %62, %67 : vector<4x384xf32>
    %c0_82 = arith.constant 0 : index
    %c18 = arith.constant 18 : index
    %69 = vector.load %arg5[%c0_82, %c18] : memref<4x512xf32, #tpu.memory_space<vmem>>, vector<4x384xf32>
    %c3_83 = arith.constant 3 : index
    %c0_84 = arith.constant 0 : index
    %c0_85 = arith.constant 0 : index
    %70 = vector.load %arg2[%c3_83, %c0_84, %c0_85] : memref<9x4x1xf32, #tpu.memory_space<vmem>>, vector<1x4x1xf32>
    %71 = vector.shape_cast %70 : vector<1x4x1xf32> to vector<4x1xf32>
    %72 = vector.broadcast %71 : vector<4x1xf32> to vector<4x384xf32>
    %73 = arith.mulf %69, %72 : vector<4x384xf32>
    %74 = arith.addf %68, %73 : vector<4x384xf32>
    %c0_86 = arith.constant 0 : index
    %c19_87 = arith.constant 19 : index
    %75 = vector.load %arg5[%c0_86, %c19_87] : memref<4x512xf32, #tpu.memory_space<vmem>>, vector<4x384xf32>
    %c4_88 = arith.constant 4 : index
    %c0_89 = arith.constant 0 : index
    %c0_90 = arith.constant 0 : index
    %76 = vector.load %arg2[%c4_88, %c0_89, %c0_90] : memref<9x4x1xf32, #tpu.memory_space<vmem>>, vector<1x4x1xf32>
    %77 = vector.shape_cast %76 : vector<1x4x1xf32> to vector<4x1xf32>
    %78 = vector.broadcast %77 : vector<4x1xf32> to vector<4x384xf32>
    %79 = arith.mulf %75, %78 : vector<4x384xf32>
    %80 = arith.addf %74, %79 : vector<4x384xf32>
    %c0_91 = arith.constant 0 : index
    %c20 = arith.constant 20 : index
    %81 = vector.load %arg5[%c0_91, %c20] : memref<4x512xf32, #tpu.memory_space<vmem>>, vector<4x384xf32>
    %c5_92 = arith.constant 5 : index
    %c0_93 = arith.constant 0 : index
    %c0_94 = arith.constant 0 : index
    %82 = vector.load %arg2[%c5_92, %c0_93, %c0_94] : memref<9x4x1xf32, #tpu.memory_space<vmem>>, vector<1x4x1xf32>
    %83 = vector.shape_cast %82 : vector<1x4x1xf32> to vector<4x1xf32>
    %84 = vector.broadcast %83 : vector<4x1xf32> to vector<4x384xf32>
    %85 = arith.mulf %81, %84 : vector<4x384xf32>
    %86 = arith.addf %80, %85 : vector<4x384xf32>
    %c0_95 = arith.constant 0 : index
    %c36 = arith.constant 36 : index
    %87 = vector.load %arg5[%c0_95, %c36] : memref<4x512xf32, #tpu.memory_space<vmem>>, vector<4x384xf32>
    %c6_96 = arith.constant 6 : index
    %c0_97 = arith.constant 0 : index
    %c0_98 = arith.constant 0 : index
    %88 = vector.load %arg2[%c6_96, %c0_97, %c0_98] : memref<9x4x1xf32, #tpu.memory_space<vmem>>, vector<1x4x1xf32>
    %89 = vector.shape_cast %88 : vector<1x4x1xf32> to vector<4x1xf32>
    %90 = vector.broadcast %89 : vector<4x1xf32> to vector<4x384xf32>
    %91 = arith.mulf %87, %90 : vector<4x384xf32>
    %92 = arith.addf %86, %91 : vector<4x384xf32>
    %c0_99 = arith.constant 0 : index
    %c37_100 = arith.constant 37 : index
    %93 = vector.load %arg5[%c0_99, %c37_100] : memref<4x512xf32, #tpu.memory_space<vmem>>, vector<4x384xf32>
    %c7_101 = arith.constant 7 : index
    %c0_102 = arith.constant 0 : index
    %c0_103 = arith.constant 0 : index
    %94 = vector.load %arg2[%c7_101, %c0_102, %c0_103] : memref<9x4x1xf32, #tpu.memory_space<vmem>>, vector<1x4x1xf32>
    %95 = vector.shape_cast %94 : vector<1x4x1xf32> to vector<4x1xf32>
    %96 = vector.broadcast %95 : vector<4x1xf32> to vector<4x384xf32>
    %97 = arith.mulf %93, %96 : vector<4x384xf32>
    %98 = arith.addf %92, %97 : vector<4x384xf32>
    %c0_104 = arith.constant 0 : index
    %c38 = arith.constant 38 : index
    %99 = vector.load %arg5[%c0_104, %c38] : memref<4x512xf32, #tpu.memory_space<vmem>>, vector<4x384xf32>
    %c8_105 = arith.constant 8 : index
    %c0_106 = arith.constant 0 : index
    %c0_107 = arith.constant 0 : index
    %100 = vector.load %arg2[%c8_105, %c0_106, %c0_107] : memref<9x4x1xf32, #tpu.memory_space<vmem>>, vector<1x4x1xf32>
    %101 = vector.shape_cast %100 : vector<1x4x1xf32> to vector<4x1xf32>
    %102 = vector.broadcast %101 : vector<4x1xf32> to vector<4x384xf32>
    %103 = arith.mulf %99, %102 : vector<4x384xf32>
    %104 = arith.addf %98, %103 : vector<4x384xf32>
    %cst_108 = arith.constant 0.000000e+00 : f32
    %105 = vector.broadcast %cst_108 : f32 to vector<4x384xf32>
    %c0_109 = arith.constant 0 : index
    %c0_110 = arith.constant 0 : index
    %c0_111 = arith.constant 0 : index
    %106 = vector.load %arg3[%c0_109, %c0_110, %c0_111] : memref<4x4x1xf32, #tpu.memory_space<vmem>>, vector<1x4x1xf32>
    %107 = vector.shape_cast %106 : vector<1x4x1xf32> to vector<4x1xf32>
    %108 = vector.extract_strided_slice %104 {offsets = [0, 0], sizes = [1, 384], strides = [1, 1]} : vector<4x384xf32> to vector<1x384xf32>
    %109 = vector.broadcast %107 : vector<4x1xf32> to vector<4x384xf32>
    %110 = vector.broadcast %108 : vector<1x384xf32> to vector<4x384xf32>
    %111 = arith.mulf %109, %110 : vector<4x384xf32>
    %112 = arith.addf %105, %111 : vector<4x384xf32>
    %c1_112 = arith.constant 1 : index
    %c0_113 = arith.constant 0 : index
    %c0_114 = arith.constant 0 : index
    %113 = vector.load %arg3[%c1_112, %c0_113, %c0_114] : memref<4x4x1xf32, #tpu.memory_space<vmem>>, vector<1x4x1xf32>
    %114 = vector.shape_cast %113 : vector<1x4x1xf32> to vector<4x1xf32>
    %115 = vector.extract_strided_slice %104 {offsets = [1, 0], sizes = [1, 384], strides = [1, 1]} : vector<4x384xf32> to vector<1x384xf32>
    %116 = vector.broadcast %114 : vector<4x1xf32> to vector<4x384xf32>
    %117 = vector.broadcast %115 : vector<1x384xf32> to vector<4x384xf32>
    %118 = arith.mulf %116, %117 : vector<4x384xf32>
    %119 = arith.addf %112, %118 : vector<4x384xf32>
    %c2_115 = arith.constant 2 : index
    %c0_116 = arith.constant 0 : index
    %c0_117 = arith.constant 0 : index
    %120 = vector.load %arg3[%c2_115, %c0_116, %c0_117] : memref<4x4x1xf32, #tpu.memory_space<vmem>>, vector<1x4x1xf32>
    %121 = vector.shape_cast %120 : vector<1x4x1xf32> to vector<4x1xf32>
    %122 = vector.extract_strided_slice %104 {offsets = [2, 0], sizes = [1, 384], strides = [1, 1]} : vector<4x384xf32> to vector<1x384xf32>
    %123 = vector.broadcast %121 : vector<4x1xf32> to vector<4x384xf32>
    %124 = vector.broadcast %122 : vector<1x384xf32> to vector<4x384xf32>
    %125 = arith.mulf %123, %124 : vector<4x384xf32>
    %126 = arith.addf %119, %125 : vector<4x384xf32>
    %c3_118 = arith.constant 3 : index
    %c0_119 = arith.constant 0 : index
    %c0_120 = arith.constant 0 : index
    %127 = vector.load %arg3[%c3_118, %c0_119, %c0_120] : memref<4x4x1xf32, #tpu.memory_space<vmem>>, vector<1x4x1xf32>
    %128 = vector.shape_cast %127 : vector<1x4x1xf32> to vector<4x1xf32>
    %129 = vector.extract_strided_slice %104 {offsets = [3, 0], sizes = [1, 384], strides = [1, 1]} : vector<4x384xf32> to vector<1x384xf32>
    %130 = vector.broadcast %128 : vector<4x1xf32> to vector<4x384xf32>
    %131 = vector.broadcast %129 : vector<1x384xf32> to vector<4x384xf32>
    %132 = arith.mulf %130, %131 : vector<4x384xf32>
    %133 = arith.addf %126, %132 : vector<4x384xf32>
    %c0_121 = arith.constant 0 : index
    %c0_122 = arith.constant 0 : index
    %c0_123 = arith.constant 0 : index
    %134 = vector.load %arg4[%c0_121, %c0_122, %c0_123] : memref<1x4x384xf32, #tpu.memory_space<vmem>>, vector<1x4x384xf32>
    %135 = vector.shape_cast %134 : vector<1x4x384xf32> to vector<4x384xf32>
    %136 = vector.shape_cast %133 : vector<4x384xf32> to vector<1x4x384xf32>
    tpu.vector_store %arg4[%c0_121, %c0_122, %c0_123], %136 {strides = array<i32>} : memref<1x4x384xf32, #tpu.memory_space<vmem>>, vector<1x4x384xf32>,
    return
  }
  func.func @transform_0(%arg0: i32) -> (i32, i32, i32, i32) {
    %c0_i32 = arith.constant 0 : i32
    %c0_i32_0 = arith.constant 0 : i32
    %c0_i32_1 = arith.constant 0 : i32
    %c0_i32_2 = arith.constant 0 : i32
    return %arg0, %c0_i32, %c0_i32_0, %c0_i32_1 : i32, i32, i32, i32
  }
  func.func @transform_1(%arg0: i32) -> (i32, i32, i32) {
    %c0_i32 = arith.constant 0 : i32
    %c0_i32_0 = arith.constant 0 : i32
    %c0_i32_1 = arith.constant 0 : i32
    %c0_i32_2 = arith.constant 0 : i32
    return %c0_i32, %c0_i32_0, %c0_i32_1 : i32, i32, i32
  }
  func.func @transform_2(%arg0: i32) -> (i32, i32, i32) {
    %c0_i32 = arith.constant 0 : i32
    %c0_i32_0 = arith.constant 0 : i32
    %c0_i32_1 = arith.constant 0 : i32
    %c0_i32_2 = arith.constant 0 : i32
    return %c0_i32, %c0_i32_0, %c0_i32_1 : i32, i32, i32
  }
  func.func @transform_3(%arg0: i32) -> (i32, i32, i32) {
    %c0_i32 = arith.constant 0 : i32
    %c0_i32_0 = arith.constant 0 : i32
    %c0_i32_1 = arith.constant 0 : i32
    return %arg0, %c0_i32, %c0_i32_0 : i32, i32, i32
  }
}

</mosaic_0001>

<bundles_post_ra>
// kernel: tpu_custom_call.1
= control target key start
LH: loop header
LB: loop body
LE: loop exit
PB: predicated region body
PF: predicated region fallthrough
CT: control target
= control target key end

     0   :  { %8 = vsyncpa [#allocation4], 0  ;;  %s1705_s0 = inlined_call_operand.hbm [shape: f32[2,4,16,16], index: 0, kind: input, shape index: {}]   ;;  %s1706_s1 = inlined_call_operand.vmem [shape: f32[9,4,1], index: 1, kind: input, shape index: {}]   ;;  %s1707_s2 = inlined_call_operand.vmem [shape: f32[4,4,1], index: 2, kind: input, shape index: {}]   ;;  %s1708_s3 = inlined_call_operand.hbm [shape: f32[2,4,384], index: 3, kind: output, shape index: {}]  }
   0x1   :  { %10 = vsyncpa [#allocation4 + $0x1], 0 }
   0x2   :  { %11 = vsyncpa [#allocation5], 0 }
   0x3   :  { %13 = vsyncpa [#allocation5 + $0x1], 0  ;;  %s1329_s12 = smov 0   ;;  %s1331_s13 = smov 0  }
   0x4   :  { %s1333_s14 = smov 0   ;;  %s1335_s15 = smov 0  }
   0x5 LB: > { %s1350_s16 = sadd.s32 4294967295, %s1279_s15   ;;  %s1088_s17 = sadd.s32 4294967294, %s1279_s15   ;;  %s1279_s15 = sphi %s1335_s15, %s1723_s15   ;;  %s1275_s14 = sphi %s1333_s14, %s1722_s14   ;;  %s1271_s13 = sphi %s1331_s13, %s1721_s13   ;;  %s1267_s12 = sphi %s1329_s12, %s1720_s12  }
   0x6   : > { %s1354_s18 = sadd.s32 1, %s1279_s15   ;;  %s26_s19 = sadd.s32 1, %s1275_s14 }
   0x7   : > { %s23_s20 = ssub.s32 %s1279_s15, %s1354_s18  ;;  %p33_p0 = scmp.ne.s32.totalorder %s1275_s14, %s1271_s13 }
   0x8   : > { %p24_p1 = scmp.eq.s32.totalorder %s23_s20, 0  ;;  %p34_p2 = scmp.eq.s32.totalorder %s1279_s15, 0 }
   0x9   : > { %p39_p3 = scmp.ne.s32.totalorder %s1271_s13, %s1267_s12  ;;  %p40_p4 = scmp.eq.s32.totalorder %s1350_s16, 0 }
   0xa   : > { %s1366_s21 = scalar_select %p24_p1, %s1275_s14, %s26_s19  }
   0xb   : > { %p1368_p5 = por %p34_p2, %p33_p0  ;;  %p1372_p6 = por %p40_p4, %p39_p3 }
   0xc   : > { %p105_p7 = scmp.eq.s32.totalorder %s1350_s16, 1  ;;  %p111_p8 = scmp.eq.s32.totalorder %s1088_s17, 1 }
   0xd   : > { %s1712_s23 = scalar_select %p1372_p6, 1, 0 }
   0xe   : > { %p1125_p10 = scmp.lt.s32.totalorder %s1279_s15, 2  ;;  %p1379_p11 = por %p105_p7, %p33_p0 }
   0xf   : > { %p1383_p12 = por %p111_p8, %p39_p3  ;;  %s137_s26 = sand.u32 1, %s1275_s14  }
  0x10   : > { %s1713_s24 = scalar_select %p1379_p11, 1, 0 }
  0x11   : > { %s1714_s25 = scalar_select %p1383_p12, 1, 0 }
  0x12   : > { %s1110_s27 = sshll.u32 %s1279_s15, 10  ;;  %s1091_s28 = sshll.u32 %s137_s26, 6 }
  0x13   : > { %s1392_s4 = scalar_lea.hbm %s1705_s0, %s1110_s27  ;;  %s141_s5 = scalar_lea.vmem [#allocation3], %s1091_s28 }
  0x14   : > { %s148_s6 = sshll.u32 %s141_s5, 4  ;;  %p1396_p13 = pnand %p1125_p10, %p1368_p5  ;;  %s1400_s6 = int_to_ptr.vmem [resolvable:$true] %s148_s6 }
  0x15   : > { %s1402_s8 = scalar_lea.sflag [#allocation4], %s137_s26  ;;  %s1187_s9 = scalar_lea.hbm %s1392_s4, 1024 }
  0x16   : > { %p1188_p0 = scmp.ne.s32.totalorder %s1392_s4, %s1187_s9  ;;  %p1189_p1 = pneg %p1396_p13 }
  0x17   : > { %s1192_s17 = scalar_lea.hbm %s1705_s0, 2048  ;;  %p1193_p4 = scmp.lt.s32.totalorder %s1392_s4, %s1705_s0 }
  0x18   : > { %p1190_p2 = pnand %p1189_p1, %p1188_p0  ;;  %p1194_p5 = scmp.lt.s32.totalorder %s1192_s17, %s1187_s9 }
  0x1a   : > { %p1191_p3 = pneg %p1190_p2  ;;  %p1195_p7 = por %p1194_p5, %p1193_p4 }
  0x1c   : > { %p1196_p8 = pnand %p1195_p7, %p1191_p3 }
  0x1e   : > { %1199 = shalt.err (!%p1196_p8)
}
  0x1f   : > { %s1200_s22 = scalar_lea.vmem %s1400_s6, 1024  ;;  %s1281_s26 = smov [#allocation3]  }
  0x20   : > { %p1201_p10 = scmp.ne.s32.totalorder %s1400_s6, %s1200_s22  ;;  %s1205_s27 = sshll.u32 %s1281_s26, 4  ;;  %s1206_s27 = int_to_ptr.vmem [resolvable:$false] %s1205_s27 }
  0x21   : > { %s1207_s28 = scalar_lea.vmem %s1206_s27, 2048  ;;  %p1208_p2 = scmp.lt.s32.totalorder %s1400_s6, %s1206_s27 }
  0x22   : > { %p1203_p9 = pnand %p1201_p10, %p1189_p1  ;;  %p1209_p12 = scmp.lt.s32.totalorder %s1207_s28, %s1200_s22 }
  0x24   : > { %p1204_p0 = pneg %p1203_p9  ;;  %p1210_p11 = por %p1209_p12, %p1208_p2 }
  0x26   : > { %p1211_p6 = pnand %p1210_p11, %p1204_p0 }
  0x28   : > { %1214 = shalt.err (!%p1211_p6)
}
  0x29   : > { %s1282_s29 = smov 128   ;;  %s1283_s30 = smov 8  }
  0x2a   : > { %1120 = dma.hbm_to_vmem [thread:$0]  (!%p1396_p13), %s1392_s4, 1024, %s1400_s6, %s1402_s8, %s1282_s29, %s1282_s29, %s1283_s30  }
  0x2b   : > { %p1094_p9 = scmp.ge.s32.totalorder %s1279_s15, 1  ;;  %p156_p1 = scmp.lt.s32.totalorder %s1279_s15, 3 }
  0x2d   : > { %p157_p3 = pnand %p1094_p9, %p156_p1 }
  0x2e   : > { %s1426_s5 = sand.u32 (!%p157_p3), 1, %s1271_s13   ;;  %p1716_p6 = scmp.ne.s32.totalorder (!%p157_p3), %s1712_s23, 0 }
  0x2f   : > { %160 = sbr.rel (%p157_p3) target bundleno = 410 (0x19a), region = 32  ;;  %s1095_s9 = sshll.u32 (!%p157_p3), %s1426_s5, 6 }
  0x30   : > { %s163_s10 = scalar_lea.sflag (!%p157_p3), [#allocation4], %s1426_s5  ;;  %s1430_s11 = scalar_lea.vmem (!%p157_p3), [#allocation3], %s1095_s9 }
  0x34   : > { %1258 = dma.done.wait (%p1716_p6), %s163_s10, 1024  }
  0x35   : > { %1260 = vsyncadd (%p1716_p6), %s163_s10, 4294966272  ;;  %v1284_v0 = vmov 0   ;;  %v1285_v1 = vmov 0.0   ;;  %vm200_vm0 = vcmask 1041409   ;;  %vm202_vm1 = vcmask 1045509   ;;  %s1286_s23 = smov 55  }
  0x36   : > { %1186 = vset.pattern.permute.xlu1 %v1284_v0  ;;  %1185 = vset.pattern.permute.xlu0 %v1284_v0  ;;  %189 = vst [vmem:[#allocation2] sm:$0xff] %v1285_v1  ;;  %190 = vst [vmem:[#allocation2 + $0x8] sm:$0xff] %v1285_v1  ;;  %vm205_vm2 = vcmask 1042434   ;;  %vm207_vm3 = vcmask 1046534   ;;  %v241_v2 = vld [vmem:[%s1430_s11 + $0x2] sm:$0x1] }
  0x37   : > { %v242_v3 = vld [vmem:[%s1430_s11 + $0x12] sm:$0x1]  ;;  %v243_v4 = vld [vmem:[%s1430_s11 + $0x22] sm:$0x1]  ;;  %v191_v8 = vld [vmem:[%s1430_s11] sm:$0x1] }
  0x38   : > { %v244_v5 = vld [vmem:[%s1430_s11 + $0x32] sm:$0x1]  ;;  %v249_v6 = vrot.slane %v242_v3, 7  ;;  %v252_v7 = vrot.slane %v243_v4, 6  ;;  %vm210_vm4 = vcmask 1043459   ;;  %vm212_vm5 = vcmask 1047559  }
  0x39   : > { %v255_v9 = vrot.slane %v244_v5, 5  ;;  %v192_v10 = vld [vmem:[%s1430_s11 + $0x10] sm:$0x1]  ;;  %v193_v11 = vld [vmem:[%s1430_s11 + $0x20] sm:$0x1]  ;;  %s1287_s4 = smov 19  }
  0x3a   : > { %v250_v12 = vsel %vm200_vm0, %v249_v6, %v241_v2  ;;  %v194_v13 = vld [vmem:[%s1430_s11 + $0x30] sm:$0x1]  ;;  %v199_v14 = vrot.slane %v192_v10, 7  ;;  %v204_v15 = vrot.slane %v193_v11, 6  ;;  %v263_v16 = vld [vmem:[%s1430_s11 + $0x3] sm:$0x1] }
  0x3b   : > { %v251_v17 = vsel %vm202_vm1, %v249_v6, %v250_v12  ;;  %v209_v18 = vrot.slane %v194_v13, 5  ;;  %v264_v19 = vld [vmem:[%s1430_s11 + $0x13] sm:$0x1]  ;;  %v265_v20 = vld [vmem:[%s1430_s11 + $0x23] sm:$0x1]  ;;  %s1288_s6 = smov 73  }
  0x3c   : > { %v253_v21 = vsel %vm205_vm2, %v252_v7, %v251_v17  ;;  %v201_v22 = vsel %vm200_vm0, %v199_v14, %v191_v8  ;;  %v266_v23 = vld [vmem:[%s1430_s11 + $0x33] sm:$0x1]  ;;  %v271_v24 = vrot.slane %v264_v19, 7  ;;  %v274_v25 = vrot.slane %v265_v20, 6  ;;  %v219_v26 = vld [vmem:[%s1430_s11 + $0x1] sm:$0x1] }
  0x3d   : > { %v254_v27 = vsel %vm207_vm3, %v252_v7, %v253_v21  ;;  %v203_v28 = vsel %vm202_vm1, %v199_v14, %v201_v22  ;;  %v277_v29 = vrot.slane %v266_v23, 5  ;;  %v220_v30 = vld [vmem:[%s1430_s11 + $0x11] sm:$0x1]  ;;  %v221_v31 = vld [vmem:[%s1430_s11 + $0x21] sm:$0x1]  ;;  %s1289_s7 = smov 37  }
  0x3e   : > { %v256_v32 = vsel %vm210_vm4, %v255_v9, %v254_v27  ;;  %v206_v33 = vsel %vm205_vm2, %v204_v15, %v203_v28  ;;  %v272_v34 = vsel %vm200_vm0, %v271_v24, %v263_v16  ;;  %v222_v35 = vld [vmem:[%s1430_s11 + $0x31] sm:$0x1]  ;;  %v227_v36 = vrot.slane %v220_v30, 7  ;;  %v286_v41 = vld [vmem:[%s1430_s11 + $0x14] sm:$0x1]  ;;  %s1290_s8 = smov 91  }
  0x3f   : > { %v257_v37 = vsel %vm212_vm5, %v255_v9, %v256_v32  ;;  %v208_v38 = vsel %vm207_vm3, %v204_v15, %v206_v33  ;;  %v273_v39 = vsel %vm202_vm1, %v271_v24, %v272_v34  ;;  %v230_v40 = vrot.slane %v221_v31, 6  ;;  %v287_v42 = vld [vmem:[%s1430_s11 + $0x24] sm:$0x1]  ;;  %v288_v48 = vld [vmem:[%s1430_s11 + $0x34] sm:$0x1]  ;;  %s1291_s17 = smov 127  }
  0x40   : > { %258 = vrot.lane.b32.xlu1 %v257_v37, %s1286_s23  ;;  %v211_v43 = vsel %vm210_vm4, %v209_v18, %v208_v38  ;;  %v275_v44 = vsel %vm205_vm2, %v274_v25, %v273_v39  ;;  %v228_v45 = vsel %vm200_vm0, %v227_v36, %v219_v26  ;;  %v233_v46 = vrot.slane %v222_v35, 5  ;;  %v285_v47 = vld [vmem:[%s1430_s11 + $0x4] sm:$0x1]  ;;  %v330_v53 = vld [vmem:[%s1430_s11 + $0x16] sm:$0x1]  ;;  %s1292_s19 = smov 17  }
  0x41   : > { %v213_v49 = vsel %vm212_vm5, %v209_v18, %v211_v43  ;;  %v276_v50 = vsel %vm207_vm3, %v274_v25, %v275_v44  ;;  %v229_v51 = vsel %vm202_vm1, %v227_v36, %v228_v45  ;;  %v293_v52 = vrot.slane %v286_v41, 7  ;;  %v331_v54 = vld [vmem:[%s1430_s11 + $0x26] sm:$0x1]  ;;  %v332_v60 = vld [vmem:[%s1430_s11 + $0x36] sm:$0x1]  ;;  %s1293_s20 = smov 109  }
  0x42   : > { %214 = vrot.lane.b32.xlu0 %v213_v49, %s1287_s4  ;;  %v278_v55 = vsel %vm210_vm4, %v277_v29, %v276_v50  ;;  %v231_v56 = vsel %vm205_vm2, %v230_v40, %v229_v51  ;;  %v296_v57 = vrot.slane %v287_v42, 6  ;;  %v299_v58 = vrot.slane %v288_v48, 5  ;;  %v329_v59 = vld [vmem:[%s1430_s11 + $0x6] sm:$0x1]  ;;  %v357_v1 = vld [vmem:[%s1430_s11 + $0x17] sm:$0x1] }
  0x43   : > { %v279_v61 = vsel %vm212_vm5, %v277_v29, %v278_v55  ;;  %v232_v62 = vsel %vm207_vm3, %v230_v40, %v231_v56  ;;  %v294_v63 = vsel %vm200_vm0, %v293_v52, %v285_v47  ;;  %v337_v0 = vrot.slane %v330_v53, 7  ;;  %v358_v2 = vld [vmem:[%s1430_s11 + $0x27] sm:$0x1]  ;;  %v359_v8 = vld [vmem:[%s1430_s11 + $0x37] sm:$0x1]  ;;  %s1294_s22 = smov 53  }
  0x44   : > { %280 = vrot.lane.b32.xlu1 %v279_v61, %s1288_s6  ;;  %v234_v3 = vsel %vm210_vm4, %v233_v46, %v232_v62  ;;  %v295_v4 = vsel %vm202_vm1, %v293_v52, %v294_v63  ;;  %v340_v5 = vrot.slane %v331_v54, 6  ;;  %v343_v6 = vrot.slane %v332_v60, 5  ;;  %v356_v7 = vld [vmem:[%s1430_s11 + $0x7] sm:$0x1]  ;;  %v308_v13 = vld [vmem:[%s1430_s11 + $0x15] sm:$0x1] }
  0x45   : > { %v235_v9 = vsel %vm212_vm5, %v233_v46, %v234_v3  ;;  %v297_v10 = vsel %vm205_vm2, %v296_v57, %v295_v4  ;;  %v338_v11 = vsel %vm200_vm0, %v337_v0, %v329_v59  ;;  %v364_v12 = vrot.slane %v357_v1, 7  ;;  %v309_v14 = vld [vmem:[%s1430_s11 + $0x25] sm:$0x1]  ;;  %v310_v20 = vld [vmem:[%s1430_s11 + $0x35] sm:$0x1]  ;;  %s1295_s26 = smov 35  }
  0x46   : > { %236 = vrot.lane.b32.xlu0 %v235_v9, %s1289_s7  ;;  %v298_v15 = vsel %vm207_vm3, %v296_v57, %v297_v10  ;;  %v339_v16 = vsel %vm202_vm1, %v337_v0, %v338_v11  ;;  %v367_v17 = vrot.slane %v358_v2, 6  ;;  %v370_v18 = vrot.slane %v359_v8, 5  ;;  %v307_v19 = vld [vmem:[%s1430_s11 + $0x5] sm:$0x1]  ;;  %v401_v25 = vld [vmem:[%s1430_s11 + $0x19] sm:$0x1] }
  0x47   : > { %v300_v21 = vsel %vm210_vm4, %v299_v58, %v298_v15  ;;  %v341_v22 = vsel %vm205_vm2, %v340_v5, %v339_v16  ;;  %v365_v23 = vsel %vm200_vm0, %v364_v12, %v356_v7  ;;  %v315_v24 = vrot.slane %v308_v13, 7  ;;  %v402_v30 = vld [vmem:[%s1430_s11 + $0x29] sm:$0x1]  ;;  %v403_v31 = vld [vmem:[%s1430_s11 + $0x39] sm:$0x1]  ;;  %s1296_s27 = smov 125  }
  0x48   : > { %v301_v26 = vsel %vm212_vm5, %v299_v58, %v300_v21  ;;  %v342_v27 = vsel %vm207_vm3, %v340_v5, %v341_v22  ;;  %v366_v28 = vsel %vm202_vm1, %v364_v12, %v365_v23  ;;  %v318_v29 = vrot.slane %v309_v14, 6  ;;  %v400_v36 = vld [vmem:[%s1430_s11 + $0x9] sm:$0x1]  ;;  %v379_v37 = vld [vmem:[%s1430_s11 + $0x18] sm:$0x1]  ;;  %s1297_s28 = smov 71  }
  0x49   : > { %302 = vrot.lane.b32.xlu1 %v301_v26, %s1290_s8  ;;  %v344_v32 = vsel %vm210_vm4, %v343_v6, %v342_v27  ;;  %v368_v33 = vsel %vm205_vm2, %v367_v17, %v366_v28  ;;  %v316_v34 = vsel %vm200_vm0, %v315_v24, %v307_v19  ;;  %v321_v35 = vrot.slane %v310_v20, 5  ;;  %v380_v42 = vld [vmem:[%s1430_s11 + $0x28] sm:$0x1]  ;;  %v381_v43 = vld [vmem:[%s1430_s11 + $0x38] sm:$0x1]  ;;  %s1298_s29 = smov 107  }
  0x4a   : > { %v345_v38 = vsel %vm212_vm5, %v343_v6, %v344_v32  ;;  %v369_v39 = vsel %vm207_vm3, %v367_v17, %v368_v33  ;;  %v317_v40 = vsel %vm202_vm1, %v315_v24, %v316_v34  ;;  %v408_v41 = vrot.slane %v401_v25, 7  ;;  %v378_v48 = vld [vmem:[%s1430_s11 + $0x8] sm:$0x1]  ;;  %v489_v49 = vld [vmem:[%s1430_s11 + $0x1d] sm:$0x1]  ;;  %s1299_s30 = smov 89  }
  0x4b   : > { %346 = vrot.lane.b32.xlu0 %v345_v38, %s1291_s17  ;;  %v371_v44 = vsel %vm210_vm4, %v370_v18, %v369_v39  ;;  %v319_v45 = vsel %vm205_vm2, %v318_v29, %v317_v40  ;;  %v411_v46 = vrot.slane %v402_v30, 6  ;;  %v414_v47 = vrot.slane %v403_v31, 5  ;;  %v490_v54 = vld [vmem:[%s1430_s11 + $0x2d] sm:$0x1]  ;;  %v491_v55 = vld [vmem:[%s1430_s11 + $0x3d] sm:$0x1] }
  0x4c   : > { %v372_v50 = vsel %vm212_vm5, %v370_v18, %v371_v44  ;;  %v320_v51 = vsel %vm207_vm3, %v318_v29, %v319_v45  ;;  %v409_v52 = vsel %vm200_vm0, %v408_v41, %v400_v36  ;;  %v386_v53 = vrot.slane %v379_v37, 7  ;;  %v488_v60 = vld [vmem:[%s1430_s11 + $0xd] sm:$0x1]  ;;  %v423_v61 = vld [vmem:[%s1430_s11 + $0x1a] sm:$0x1]  ;;  %s1300_s9 = smov 33  }
  0x4d   : > { %373 = vrot.lane.b32.xlu1 %v372_v50, %s1292_s19  ;;  %v322_v56 = vsel %vm210_vm4, %v321_v35, %v320_v51  ;;  %v410_v57 = vsel %vm202_vm1, %v408_v41, %v409_v52  ;;  %v389_v58 = vrot.slane %v380_v42, 6  ;;  %v392_v59 = vrot.slane %v381_v43, 5  ;;  %v424_v2 = vld [vmem:[%s1430_s11 + $0x2a] sm:$0x1]  ;;  %v425_v8 = vld [vmem:[%s1430_s11 + $0x3a] sm:$0x1] }
  0x4e   : > { %v323_v62 = vsel %vm212_vm5, %v321_v35, %v322_v56  ;;  %v412_v63 = vsel %vm205_vm2, %v411_v46, %v410_v57  ;;  %v387_v0 = vsel %vm200_vm0, %v386_v53, %v378_v48  ;;  %v496_v1 = vrot.slane %v489_v49, 7  ;;  %v422_v7 = vld [vmem:[%s1430_s11 + $0xa] sm:$0x1]  ;;  %v467_v13 = vld [vmem:[%s1430_s11 + $0x1c] sm:$0x1]  ;;  %s1301_s23 = smov 15  }
  0x4f   : > { %324 = vrot.lane.b32.xlu0 %v323_v62, %s1293_s20  ;;  %v413_v3 = vsel %vm207_vm3, %v411_v46, %v412_v63  ;;  %v388_v4 = vsel %vm202_vm1, %v386_v53, %v387_v0  ;;  %v499_v5 = vrot.slane %v490_v54, 6  ;;  %v502_v6 = vrot.slane %v491_v55, 5  ;;  %v468_v18 = vld [vmem:[%s1430_s11 + $0x2c] sm:$0x1]  ;;  %v469_v19 = vld [vmem:[%s1430_s11 + $0x3c] sm:$0x1] }
  0x50   : > { %v415_v9 = vsel %vm210_vm4, %v414_v47, %v413_v3  ;;  %v390_v10 = vsel %vm205_vm2, %v389_v58, %v388_v4  ;;  %v497_v11 = vsel %vm200_vm0, %v496_v1, %v488_v60  ;;  %v430_v12 = vrot.slane %v423_v61, 7  ;;  %v466_v24 = vld [vmem:[%s1430_s11 + $0xc] sm:$0x1]  ;;  %v445_v25 = vld [vmem:[%s1430_s11 + $0x1b] sm:$0x1]  ;;  %s1303_s7 = smov 126  }
  0x51   : > { %v416_v14 = vsel %vm212_vm5, %v414_v47, %v415_v9  ;;  %v391_v15 = vsel %vm207_vm3, %v389_v58, %v390_v10  ;;  %v498_v16 = vsel %vm202_vm1, %v496_v1, %v497_v11  ;;  %v433_v17 = vrot.slane %v424_v2, 6  ;;  %v446_v30 = vld [vmem:[%s1430_s11 + $0x2b] sm:$0x1]  ;;  %v447_v31 = vld [vmem:[%s1430_s11 + $0x3b] sm:$0x1]  ;;  %s1304_s19 = smov 110  }
  0x52   : > { %417 = vrot.lane.b32.xlu1 %v416_v14, %s1294_s22  ;;  %v393_v20 = vsel %vm210_vm4, %v392_v59, %v391_v15  ;;  %v500_v21 = vsel %vm205_vm2, %v499_v5, %v498_v16  ;;  %v431_v22 = vsel %vm200_vm0, %v430_v12, %v422_v7  ;;  %v436_v23 = vrot.slane %v425_v8, 5  ;;  %v444_v36 = vld [vmem:[%s1430_s11 + $0xb] sm:$0x1]  ;;  %v538_v37 = vld [vmem:[%s1430_s11 + $0x1f] sm:$0x1]  ;;  %s1306_s22 = smov 92  }
  0x53   : > { %v394_v26 = vsel %vm212_vm5, %v392_v59, %v393_v20  ;;  %v501_v27 = vsel %vm207_vm3, %v499_v5, %v500_v21  ;;  %v432_v28 = vsel %vm202_vm1, %v430_v12, %v431_v22  ;;  %v474_v29 = vrot.slane %v467_v13, 7  ;;  %v539_v42 = vld [vmem:[%s1430_s11 + $0x2f] sm:$0x1]  ;;  %v540_v43 = vld [vmem:[%s1430_s11 + $0x3f] sm:$0x1]  ;;  %p1717_p12 = scmp.ne.s32.totalorder %s1713_s24, 0 }
  0x54   : > { %395 = vrot.lane.b32.xlu0 %v394_v26, %s1295_s26  ;;  %v503_v32 = vsel %vm210_vm4, %v502_v6, %v501_v27  ;;  %v434_v33 = vsel %vm205_vm2, %v433_v17, %v432_v28  ;;  %v477_v34 = vrot.slane %v468_v18, 6  ;;  %v480_v35 = vrot.slane %v469_v19, 5  ;;  %v537_v48 = vld [vmem:[%s1430_s11 + $0xf] sm:$0x1]  ;;  %v516_v49 = vld [vmem:[%s1430_s11 + $0x1e] sm:$0x1] }
  0x55   : > { %v504_v38 = vsel %vm212_vm5, %v502_v6, %v503_v32  ;;  %v435_v39 = vsel %vm207_vm3, %v433_v17, %v434_v33  ;;  %v475_v40 = vsel %vm200_vm0, %v474_v29, %v466_v24  ;;  %v452_v41 = vrot.slane %v445_v25, 7  ;;  %v517_v54 = vld [vmem:[%s1430_s11 + $0x2e] sm:$0x1]  ;;  %v518_v60 = vld [vmem:[%s1430_s11 + $0x3e] sm:$0x1] }
  0x56   : > { %505 = vrot.lane.b32.xlu1 %v504_v38, %s1296_s27  ;;  %v437_v44 = vsel %vm210_vm4, %v436_v23, %v435_v39  ;;  %v476_v45 = vsel %vm202_vm1, %v474_v29, %v475_v40  ;;  %v455_v46 = vrot.slane %v446_v30, 6  ;;  %v458_v47 = vrot.slane %v447_v31, 5  ;;  %v515_v59 = vld [vmem:[%s1430_s11 + $0xe] sm:$0x1]  ;;  %v1097_v18 = vld [vmem:[%s1706_s1 + $0x8] sm:$0xf] }
  0x57   : > { %v438_v50 = vsel %vm212_vm5, %v436_v23, %v437_v44  ;;  %v478_v51 = vsel %vm205_vm2, %v477_v34, %v476_v45  ;;  %v453_v52 = vsel %vm200_vm0, %v452_v41, %v444_v36  ;;  %v545_v53 = vrot.slane %v538_v37, 7  ;;  %v1096_v19 = vld [vmem:[%s1706_s1 + $0x4] sm:$0xf]  ;;  %v1098_v20 = vld [vmem:[%s1706_s1 + $0xc] sm:$0xf]  ;;  %s1111_s11 = smul.u32 12, %s1426_s5 }
  0x58   : > { %439 = vrot.lane.b32.xlu0 %v438_v50, %s1297_s28  ;;  %v479_v55 = vsel %vm207_vm3, %v477_v34, %v478_v51  ;;  %v454_v56 = vsel %vm202_vm1, %v452_v41, %v453_v52  ;;  %v548_v57 = vrot.slane %v539_v42, 6  ;;  %v551_v58 = vrot.slane %v540_v43, 5  ;;  %v1099_v21 = vld [vmem:[%s1706_s1 + $0x10] sm:$0xf]  ;;  %v1100_v22 = vld [vmem:[%s1706_s1 + $0x14] sm:$0xf] }
  0x59   : > { %v481_v61 = vsel %vm210_vm4, %v480_v35, %v479_v55  ;;  %v456_v62 = vsel %vm205_vm2, %v455_v46, %v454_v56  ;;  %v546_v63 = vsel %vm200_vm0, %v545_v53, %v537_v48  ;;  %v523_v0 = vrot.slane %v516_v49, 7  ;;  %v1101_v23 = vld [vmem:[%s1706_s1 + $0x18] sm:$0xf]  ;;  %v1102_v24 = vld [vmem:[%s1706_s1 + $0x1c] sm:$0xf]  ;;  %s188_s4 = scalar_lea.vmem [#allocation6], %s1111_s11 }
  0x5a   : > { %v482_v1 = vsel %vm212_vm5, %v480_v35, %v481_v61  ;;  %v457_v2 = vsel %vm207_vm3, %v455_v46, %v456_v62  ;;  %v547_v3 = vsel %vm202_vm1, %v545_v53, %v546_v63  ;;  %v526_v4 = vrot.slane %v517_v54, 6  ;;  %v1103_v25 = vld [vmem:[%s1706_s1 + $0x20] sm:$0xf]  ;;  %s1018_s6 = sshll.u32 %s188_s4, 4  ;;  %s1019_s6 = int_to_ptr.vmem [resolvable:$true] %s1018_s6 }
  0x5b   : > { %483 = vrot.lane.b32.xlu1 %v482_v1, %s1298_s29  ;;  %v459_v5 = vsel %vm210_vm4, %v458_v47, %v457_v2  ;;  %v549_v6 = vsel %vm205_vm2, %v548_v57, %v547_v3  ;;  %v524_v7 = vsel %vm200_vm0, %v523_v0, %v515_v59  ;;  %v529_v8 = vrot.slane %v518_v60, 5  ;;  %v561_v26 = vld [vmem:[%s1706_s1] sm:$0xf] }
  0x5c   : > { %v460_v9 = vsel %vm212_vm5, %v458_v47, %v459_v5  ;;  %v550_v10 = vsel %vm207_vm3, %v548_v57, %v549_v6  ;;  %v525_v11 = vsel %vm202_vm1, %v523_v0, %v524_v7  ;;  %vm217_vm6 = vcmask 281752  }
  0x5d   : > { %461 = vrot.lane.b32.xlu0 %v460_v9, %s1299_s30  ;;  %v552_v12 = vsel %vm210_vm4, %v551_v58, %v550_v10  ;;  %v527_v13 = vsel %vm205_vm2, %v526_v4, %v525_v11  ;;  %vm239_vm7 = vcmask 429352   ;;  %vm261_vm8 = vcmask 576952  }
  0x5e   : > { %v553_v14 = vsel %vm212_vm5, %v551_v58, %v552_v12  ;;  %v528_v15 = vsel %vm207_vm3, %v526_v4, %v527_v13  ;;  %vm283_vm9 = vcmask 724552   ;;  %vm305_vm10 = vcmask 872152  }
  0x5f   : > { %554 = vrot.lane.b32.xlu1 %v553_v14, %s1300_s9  ;;  %v530_v16 = vsel %vm210_vm4, %v529_v8, %v528_v15  ;;  %vm352_vm11 = vcmask 1044472   ;;  %vm353_vm12 = vcmask 121860   ;;  %vm349_vm13 = vcmask 1039360  }
  0x60   : > { %v531_v17 = vsel %vm212_vm5, %v529_v8, %v530_v16  ;;  %vm327_vm14 = vcmask 1019752   ;;  %vm354_vm15 = vmor %vm353_vm12, %vm352_vm11  ;;  %vm376_vm0 = vcmask 265352   ;;  %vm398_vm1 = vcmask 412952  }
  0x61   : > { %532 = vrot.lane.b32.xlu0 %v531_v17, %s1301_s23  ;;  %vm420_vm2 = vcmask 560552   ;;  %vm442_vm3 = vcmask 708152   ;;  %vm508_vm4 = vcmask 1022976   ;;  %vm511_vm5 = vcmask 1044456   ;;  %s1112_s23 = smul.u32 192, %s1350_s16  ;;  %s1308_s16 = smov [#allocation6]  }
  0x62   : > { %vm557_vm11 = vcmask 396552   ;;  %v1302_v47 = vmov 839922192   ;;  %v569_v49 = vlaneseq  ;;  %vm604_vm12 = vcmask 1043456   ;;  %s1219_s26 = sshll.u32 %s1308_s16, 4  ;;  %s1220_s26 = int_to_ptr.vmem [resolvable:$false] %s1219_s26 }
  0x63   : > { %616 = vperm.xlu1 %1186, %v1097_v18   ;;  %v567_v48 = vunpack.c.l.s4 %v1302_v47  ;;  %s1221_s27 = scalar_lea.vmem %s1220_s26, 384  ;;  %p1222_p5 = scmp.lt.s32.totalorder %s1019_s6, %s1220_s26 }
  0x64   : > { %v1627_v51 = vshrl.u32 %v569_v49, 7 }
  0x65   : > { %584 = vperm.xlu0 %1185, %v1096_v19   ;;  %v568_v50 = vunpack.c.0.s8 %v567_v48 }
  0x67   : > { %648 = vperm.xlu1 %1186, %v1098_v20   ;;  %v571_v52 = vsub.s32 %v568_v50, %v1627_v51 }
  0x69   : > { %680 = vperm.xlu0 %1185, %v1099_v21  }
  0x6b   : > { %712 = vperm.xlu1 %1186, %v1100_v22  }
  0x6d   : > { %744 = vperm.xlu0 %1185, %v1101_v23  }
  0x6f   : > { %776 = vperm.xlu1 %1186, %v1102_v24  }
  0x71   : > { %808 = vperm.xlu0 %1185, %v1103_v25  }
  0x73   : > { %564 = vperm.xlu1 %1186, %v561_v26   ;;  %v836_v26 = vld [vmem:[%s1707_s2] sm:$0xf] }
  0xb2   : > { %v259_v27 = vpop.permute.xlu1 %258 }
  0xb4   : > { %v215_v28 = vpop.permute.xlu0 %214 }
  0xb5   : > { %218 = vst.msk [vmem:[#allocation2] sm:$0xf] %vm217_vm6, %v215_v28  ;;  %vm512_vm6 = vcmask 105476   ;;  %v1105_v28 = vld [vmem:[%s1707_s2 + $0x8] sm:$0xf] }
  0xb6   : > { %v281_v29 = vpop.permute.xlu1 %280 }
  0xb8   : > { %v237_v30 = vpop.permute.xlu0 %236 }
  0xb9   : > { %240 = vst.msk [vmem:[#allocation2] sm:$0xf] %vm239_vm7, %v237_v30  ;;  %vm464_vm7 = vcmask 855752  }
  0xba   : > { %262 = vst.msk [vmem:[#allocation2] sm:$0xf] %vm261_vm8, %v259_v27  ;;  %vm486_vm8 = vcmask 1003352   ;;  %v1104_v27 = vld [vmem:[%s1707_s2 + $0x4] sm:$0xf] }
  0xbb   : > { %284 = vst.msk [vmem:[#allocation2] sm:$0xf] %vm283_vm9, %v281_v29  ;;  %v303_v31 = vpop.permute.xlu1 %302  ;;  %vm513_vm9 = vmor %vm512_vm6, %vm511_vm5  ;;  %v1106_v29 = vld [vmem:[%s1707_s2 + $0xc] sm:$0xf] }
  0xbc   : > { %306 = vst.msk [vmem:[#allocation2] sm:$0xf] %vm305_vm10, %v303_v31  ;;  %vm535_vm10 = vcmask 248952  }
  0xbd   : > { %v347_v32 = vpop.permute.xlu0 %346 }
  0xbe   : > { %v348_v33 = vrot.slane %v347_v32, 4 }
  0xbf   : > { %v374_v34 = vpop.permute.xlu1 %373 }
  0xc0   : > { %v350_v36 = vsel %vm349_vm13, %v348_v33, %v347_v32 }
  0xc1   : > { %v325_v35 = vpop.permute.xlu0 %324 }
  0xc2   : > { %328 = vst.msk [vmem:[#allocation2] sm:$0xf] %vm327_vm14, %v325_v35  ;;  %vm637_vm14 = vcmask 1031168  }
  0xc3   : > { %355 = vst.msk [vmem:[#allocation2] sm:$0xff] %vm354_vm15, %v350_v36  ;;  %vm669_vm15 = vcmask 900096  }
  0xc4   : > { %377 = vst.msk [vmem:[#allocation2 + $0x4] sm:$0xf] %vm376_vm0, %v374_v34  ;;  %v418_v37 = vpop.permute.xlu1 %417  ;;  %vm701_vm0 = vcmask 891904  }
  0xc6   : > { %v396_v38 = vpop.permute.xlu0 %395 }
  0xc7   : > { %399 = vst.msk [vmem:[#allocation2 + $0x4] sm:$0xf] %vm398_vm1, %v396_v38  ;;  %vm765_vm1 = vcmask 752640  }
  0xc8   : > { %421 = vst.msk [vmem:[#allocation2 + $0x4] sm:$0xf] %vm420_vm2, %v418_v37  ;;  %v506_v39 = vpop.permute.xlu1 %505  ;;  %vm797_vm2 = vcmask 744448  }
  0xc9   : > { %v507_v41 = vrot.slane %v506_v39, 4 }
  0xca   : > { %v440_v40 = vpop.permute.xlu0 %439 }
  0xcb   : > { %443 = vst.msk [vmem:[#allocation2 + $0x4] sm:$0xf] %vm442_vm3, %v440_v40  ;;  %v509_v43 = vsel %vm508_vm4, %v507_v41, %v506_v39  ;;  %vm829_vm3 = vcmask 736256  }
  0xcd   : > { %v484_v42 = vpop.permute.xlu1 %483 }
  0xcf   : > { %v462_v44 = vpop.permute.xlu0 %461 }
  0xd0   : > { %465 = vst.msk [vmem:[#allocation2 + $0x4] sm:$0xf] %vm464_vm7, %v462_v44 }
  0xd1   : > { %487 = vst.msk [vmem:[#allocation2 + $0x4] sm:$0xf] %vm486_vm8, %v484_v42  ;;  %v555_v45 = vpop.permute.xlu1 %554 }
  0xd2   : > { %514 = vst.msk [vmem:[#allocation2 + $0x4] sm:$0xff] %vm513_vm9, %v509_v43 }
  0xd3   : > { %v533_v46 = vpop.permute.xlu0 %532 }
  0xd4   : > { %536 = vst.msk [vmem:[#allocation2 + $0x8] sm:$0xf] %vm535_vm10, %v533_v46 }
  0xd5   : > { %558 = vst.msk [vmem:[#allocation2 + $0x8] sm:$0xf] %vm557_vm11, %v555_v45 }
  0xd9   : > { %v578_v56 = vld [vmem:[#allocation2] sm:$0xff] }
  0xdc   : > { %v579_v57 = vld [vmem:[#allocation2 + $0x8] sm:$0xff] }
  0xdd   : > { %v560_v46 = vld [vmem:[#allocation2 + $0x8] sm:$0xf] }
  0xde   : > { %v617_v53 = vpop.permute.xlu1 %616 }
  0xdf   : > { %v624_v59 = vrot.slane %v617_v53, %v571_v52 }
  0xe0   : > { %v585_v54 = vpop.permute.xlu0 %584 }
  0xe1   : > { %v592_v55 = vrot.slane %v585_v54, %v571_v52  ;;  %v626_v63 = vmul.f32 %v624_v59, %v578_v56  ;;  %v627_v0 = vmul.f32 %v624_v59, %v579_v57 }
  0xe2   : > { %v649_v58 = vpop.permute.xlu1 %648 }
  0xe3   : > { %v594_v60 = vmul.f32 %v592_v55, %v578_v56  ;;  %v595_v61 = vmul.f32 %v592_v55, %v579_v57  ;;  %v656_v1 = vrot.slane %v649_v58, %v571_v52 }
  0xe4   : > { %v681_v2 = vpop.permute.xlu0 %680 }
  0xe5   : > { %598 = vrot.lane.b32.xlu0 %v594_v60, %s1291_s17  ;;  %600 = vrot.lane.b32.xlu1 %v595_v61, %s1291_s17  ;;  %v658_v4 = vmul.f32 %v656_v1, %v578_v56  ;;  %v659_v5 = vmul.f32 %v656_v1, %v579_v57  ;;  %v688_v6 = vrot.slane %v681_v2, %v571_v52  ;;  %s1305_s17 = smov 108  }
  0xe6   : > { %v713_v62 = vpop.permute.xlu1 %712 }
  0xe7   : > { %v690_v8 = vmul.f32 %v688_v6, %v578_v56  ;;  %v691_v9 = vmul.f32 %v688_v6, %v579_v57  ;;  %v720_v10 = vrot.slane %v713_v62, %v571_v52 }
  0xe8   : > { %v745_v12 = vpop.permute.xlu0 %744 }
  0xe9   : > { %630 = vrot.lane.b32.xlu0 %v626_v63, %s1303_s7  ;;  %632 = vrot.lane.b32.xlu1 %v627_v0, %s1303_s7  ;;  %v722_v14 = vmul.f32 %v720_v10, %v578_v56  ;;  %v723_v15 = vmul.f32 %v720_v10, %v579_v57  ;;  %v752_v16 = vrot.slane %v745_v12, %v571_v52 }
  0xea   : > { %v777_v3 = vpop.permute.xlu1 %776 }
  0xeb   : > { %v754_v17 = vmul.f32 %v752_v16, %v578_v56  ;;  %v755_v18 = vmul.f32 %v752_v16, %v579_v57  ;;  %v784_v19 = vrot.slane %v777_v3, %v571_v52 }
  0xec   : > { %v809_v20 = vpop.permute.xlu0 %808 }
  0xed   : > { %662 = vrot.lane.b32.xlu0 %v658_v4, %s1304_s19  ;;  %664 = vrot.lane.b32.xlu1 %v659_v5, %s1304_s19  ;;  %v786_v21 = vmul.f32 %v784_v19, %v578_v56  ;;  %v787_v22 = vmul.f32 %v784_v19, %v579_v57  ;;  %v816_v23 = vrot.slane %v809_v20, %v571_v52 }
  0xee   : > { %v565_v7 = vpop.permute.xlu1 %564 }
  0xef   : > { %v572_v11 = vrot.slane %v565_v7, %v571_v52  ;;  %v818_v24 = vmul.f32 %v816_v23, %v578_v56  ;;  %v819_v25 = vmul.f32 %v816_v23, %v579_v57 }
  0xf1   : > { %v1632_v13 = vmul.f32 %v578_v56, %v572_v11  ;;  %694 = vrot.lane.b32.xlu0 %v690_v8, %s1293_s20  ;;  %696 = vrot.lane.b32.xlu1 %v691_v9, %s1293_s20  ;;  %s1307_s20 = smov 90   ;;  %v575_v52 = vmul.f32 %v572_v11, %v560_v46  ;;  %v926_v46 = vsub.s32 2, %v1627_v51 }
  0xf5   : > { %726 = vrot.lane.b32.xlu0 %v722_v14, %s1305_s17  ;;  %728 = vrot.lane.b32.xlu1 %v723_v15, %s1305_s17  ;;  %s1016_s17 = scalar_lea.hbm %s1708_s3, %s1112_s23 }
  0xf9   : > { %758 = vrot.lane.b32.xlu0 %v754_v17, %s1306_s22  ;;  %760 = vrot.lane.b32.xlu1 %v755_v18, %s1306_s22  ;;  %s1004_s22 = scalar_lea.sflag [#allocation5], %s1426_s5 }
  0xfd   : > { %790 = vrot.lane.b32.xlu0 %v786_v21, %s1290_s8  ;;  %792 = vrot.lane.b32.xlu1 %v787_v22, %s1290_s8 }
 0x101   : > { %822 = vrot.lane.b32.xlu0 %v818_v24, %s1307_s20  ;;  %824 = vrot.lane.b32.xlu1 %v819_v25, %s1307_s20  ;;  %s1215_s20 = scalar_lea.vmem %s1019_s6, 192 }
 0x102   : > { %p1216_p11 = scmp.ne.s32.totalorder %s1019_s6, %s1215_s20  ;;  %p1223_p7 = scmp.lt.s32.totalorder %s1221_s27, %s1215_s20 }
 0x104   : > { %p1217_p13 = pnand %p1216_p11, %p1717_p12  ;;  %p1224_p8 = por %p1223_p7, %p1222_p5 }
 0x105   : > { %839 = vperm.xlu0 %1185, %v836_v26   ;;  %881 = vperm.xlu1 %1186, %v1104_v27  }
 0x106   : > { %p1218_p4 = pneg %p1217_p13 }
 0x108   : > { %p1225_p10 = pnand %p1224_p8, %p1218_p4 }
 0x109   : > { %921 = vperm.xlu0 %1185, %v1105_v28   ;;  %961 = vperm.xlu1 %1186, %v1106_v29  }
 0x157   : > { %v599_v30 = vpop.permute.xlu0 %598  ;;  %v601_v31 = vpop.permute.xlu1 %600 }
 0x158   : > { %v602_v34 = vrot.slane %v599_v30, 4  ;;  %v603_v35 = vrot.slane %v601_v31, 4 }
 0x15a   : > { %v605_v40 = vsel %vm604_vm12, %v602_v34, %v603_v35  ;;  %v607_v48 = vsel %vm349_vm13, %v601_v31, %v603_v35 }
 0x15b   : > { %v631_v32 = vpop.permute.xlu0 %630  ;;  %v633_v33 = vpop.permute.xlu1 %632  ;;  %v606_v47 = vsel %vm349_vm13, %v599_v30, %v605_v40  ;;  %v611_v60 = vadd.f32 %v607_v48, %v575_v52  ;;  %vm733_vm13 = vcmask 883712   ;;  %v930_v52 = vsub.s32 6, %v1627_v51 }
 0x15c   : > { %v634_v38 = vrot.slane %v631_v32, 4  ;;  %v635_v39 = vrot.slane %v633_v33, 4  ;;  %v610_v61 = vadd.f32 %v606_v47, %v1632_v13  ;;  %v966_v47 = vsub.s32 3, %v1627_v51 }
 0x15e   : > { %v636_v45 = vsel %vm604_vm12, %v634_v38, %v635_v39  ;;  %v639_v53 = vsel %vm637_vm14, %v633_v33, %v635_v39  ;;  %v846_v38 = vsub.s32 0, %v1627_v51 }
 0x15f   : > { %v663_v36 = vpop.permute.xlu0 %662  ;;  %v665_v37 = vpop.permute.xlu1 %664  ;;  %v638_v56 = vsel %vm637_vm14, %v631_v32, %v636_v45  ;;  %v643_v1 = vadd.f32 %v639_v53, %v611_v60 }
 0x160   : > { %v666_v43 = vrot.slane %v663_v36, 4  ;;  %v667_v44 = vrot.slane %v665_v37, 4  ;;  %v642_v0 = vadd.f32 %v638_v56, %v610_v61 }
 0x162   : > { %v668_v57 = vsel %vm604_vm12, %v666_v43, %v667_v44  ;;  %v671_v62 = vsel %vm669_vm15, %v665_v37, %v667_v44  ;;  %v890_v44 = vsub.s32 5, %v1627_v51 }
 0x163   : > { %v695_v41 = vpop.permute.xlu0 %694  ;;  %v697_v42 = vpop.permute.xlu1 %696  ;;  %v670_v2 = vsel %vm669_vm15, %v663_v36, %v668_v57  ;;  %v675_v9 = vadd.f32 %v671_v62, %v643_v1 }
 0x164   : > { %v698_v49 = vrot.slane %v695_v41, 4  ;;  %v699_v50 = vrot.slane %v697_v42, 4  ;;  %v674_v11 = vadd.f32 %v670_v2, %v642_v0 }
 0x166   : > { %v700_v63 = vsel %vm604_vm12, %v698_v49, %v699_v50  ;;  %v703_v5 = vsel %vm701_vm0, %v697_v42, %v699_v50  ;;  %v886_v42 = vsub.s32 1, %v1627_v51 }
 0x167   : > { %v727_v54 = vpop.permute.xlu0 %726  ;;  %v729_v55 = vpop.permute.xlu1 %728  ;;  %v702_v10 = vsel %vm701_vm0, %v695_v41, %v700_v63  ;;  %v707_v14 = vadd.f32 %v703_v5, %v675_v9  ;;  %v850_v41 = vsub.s32 4, %v1627_v51 }
 0x168   : > { %v730_v58 = vrot.slane %v727_v54, 4  ;;  %v731_v59 = vrot.slane %v729_v55, 4  ;;  %v706_v18 = vadd.f32 %v702_v10, %v674_v11 }
 0x16a   : > { %v732_v6 = vsel %vm604_vm12, %v730_v58, %v731_v59  ;;  %v735_v12 = vsel %vm733_vm13, %v729_v55, %v731_v59  ;;  %v970_v55 = vsub.s32 7, %v1627_v51 }
 0x16b   : > { %v759_v3 = vpop.permute.xlu0 %758  ;;  %v761_v4 = vpop.permute.xlu1 %760  ;;  %v734_v15 = vsel %vm733_vm13, %v727_v54, %v732_v6  ;;  %v739_v22 = vadd.f32 %v735_v12, %v707_v14 }
 0x16c   : > { %v762_v7 = vrot.slane %v759_v3, 4  ;;  %v763_v8 = vrot.slane %v761_v4, 4  ;;  %v738_v24 = vadd.f32 %v734_v15, %v706_v18 }
 0x16e   : > { %v764_v13 = vsel %vm604_vm12, %v762_v7, %v763_v8  ;;  %v767_v19 = vsel %vm765_vm1, %v761_v4, %v763_v8 }
 0x16f   : > { %v791_v16 = vpop.permute.xlu0 %790  ;;  %v793_v17 = vpop.permute.xlu1 %792  ;;  %v766_v23 = vsel %vm765_vm1, %v759_v3, %v764_v13  ;;  %v771_v27 = vadd.f32 %v767_v19, %v739_v22 }
 0x170   : > { %v794_v20 = vrot.slane %v791_v16, 4  ;;  %v795_v21 = vrot.slane %v793_v17, 4  ;;  %v770_v31 = vadd.f32 %v766_v23, %v738_v24 }
 0x172   : > { %v796_v25 = vsel %vm604_vm12, %v794_v20, %v795_v21  ;;  %v799_v26 = vsel %vm797_vm2, %v793_v17, %v795_v21 }
 0x173   : > { %v798_v28 = vsel %vm797_vm2, %v791_v16, %v796_v25  ;;  %v823_v29 = vpop.permute.xlu0 %822  ;;  %v825_v30 = vpop.permute.xlu1 %824  ;;  %v803_v34 = vadd.f32 %v799_v26, %v771_v27 }
 0x174   : > { %v826_v32 = vrot.slane %v823_v29, 4  ;;  %v827_v33 = vrot.slane %v825_v30, 4  ;;  %v802_v35 = vadd.f32 %v798_v28, %v770_v31 }
 0x176   : > { %v828_v36 = vsel %vm604_vm12, %v826_v32, %v827_v33  ;;  %v831_v37 = vsel %vm829_vm3, %v825_v30, %v827_v33 }
 0x177   : > { %v830_v39 = vsel %vm829_vm3, %v823_v29, %v828_v36  ;;  %v835_v40 = vadd.f32 %v831_v37, %v803_v34 }
 0x178   : > { %v834_v43 = vadd.f32 %v830_v39, %v802_v35 }
 0x179   : > { %v855_v45 = vrot.slane %v835_v40, %v846_v38  ;;  %v895_v54 = vrot.slane %v835_v40, %v886_v42  ;;  %v935_v58 = vrot.slane %v835_v40, %v926_v46  ;;  %v975_v59 = vrot.slane %v835_v40, %v966_v47 }
 0x17a   : > { %v847_v48 = vrot.slane %v834_v43, %v846_v38  ;;  %v851_v49 = vrot.slane %v834_v43, %v850_v41  ;;  %v887_v50 = vrot.slane %v834_v43, %v886_v42  ;;  %v891_v53 = vrot.slane %v834_v43, %v890_v44 }
 0x17b   : > { %v870_v56 = vrot.slane %v855_v45, %v846_v38  ;;  %v927_v57 = vrot.slane %v834_v43, %v926_v46  ;;  %v931_v63 = vrot.slane %v834_v43, %v930_v52  ;;  %v910_v3 = vrot.slane %v895_v54, %v886_v42 }
 0x17c   : > { %v862_v60 = vrot.slane %v847_v48, %v846_v38  ;;  %v866_v61 = vrot.slane %v851_v49, %v846_v38  ;;  %v902_v62 = vrot.slane %v887_v50, %v886_v42  ;;  %v906_v1 = vrot.slane %v891_v53, %v886_v42 }
 0x17d   : > { %v967_v4 = vrot.slane %v834_v43, %v966_v47  ;;  %v971_v5 = vrot.slane %v834_v43, %v970_v55  ;;  %v942_v11 = vrot.slane %v927_v57, %v926_v46  ;;  %v946_v12 = vrot.slane %v931_v63, %v926_v46 }
 0x17e   : > { %v950_v13 = vrot.slane %v935_v58, %v926_v46  ;;  %v990_v14 = vrot.slane %v975_v59, %v966_v47 }
 0x17f   : > { %v982_v18 = vrot.slane %v967_v4, %v966_v47  ;;  %v986_v19 = vrot.slane %v971_v5, %v966_v47 }
 0x180   : > { %v840_v0 = vpop.permute.xlu0 %839  ;;  %v882_v2 = vpop.permute.xlu1 %881 }
 0x181   : > { %v871_v6 = vmul.f32 %v862_v60, %v840_v0  ;;  %v872_v7 = vmul.f32 %v866_v61, %v840_v0  ;;  %v873_v8 = vmul.f32 %v870_v56, %v840_v0  ;;  %v911_v9 = vmul.f32 %v902_v62, %v882_v2 }
 0x182   : > { %v912_v51 = vmul.f32 %v906_v1, %v882_v2  ;;  %v913_v10 = vmul.f32 %v910_v3, %v882_v2 }
 0x183   : > { %v914_v15 = vadd.f32 %v911_v9, %v871_v6 }
 0x184   : > { %v915_v16 = vadd.f32 %v912_v51, %v872_v7  ;;  %v922_v17 = vpop.permute.xlu0 %921  ;;  %v962_v20 = vpop.permute.xlu1 %961  ;;  %v916_v21 = vadd.f32 %v913_v10, %v873_v8 }
 0x185   : > { %v951_v22 = vmul.f32 %v942_v11, %v922_v17  ;;  %v952_v23 = vmul.f32 %v946_v12, %v922_v17  ;;  %v953_v24 = vmul.f32 %v950_v13, %v922_v17  ;;  %v991_v25 = vmul.f32 %v982_v18, %v962_v20 }
 0x186   : > { %v992_v26 = vmul.f32 %v986_v19, %v962_v20  ;;  %v993_v30 = vmul.f32 %v990_v14, %v962_v20 }
 0x187   : > { %v954_v27 = vadd.f32 %v951_v22, %v914_v15  ;;  %v955_v28 = vadd.f32 %v952_v23, %v915_v16  ;;  %v956_v29 = vadd.f32 %v953_v24, %v916_v21 }
 0x189   : > { %v994_v31 = vadd.f32 %v991_v25, %v954_v27  ;;  %v995_v32 = vadd.f32 %v992_v26, %v955_v28  ;;  %v996_v33 = vadd.f32 %v993_v30, %v956_v29 }
 0x18b   : > { %v999_v34 = vcombine.low %v994_v31, %v995_v32  ;;  %1002 = vst [vmem:[%s188_s4 + $0x8] sm:$0xf] %v996_v33 }
 0x18d   : > { %1001 = vst [vmem:[%s188_s4] sm:$0xff] %v999_v34 }
 0x18e   : > { %1228 = shalt.err (!%p1225_p10)
}
 0x18f   : > { %s1229_s28 = scalar_lea.hbm %s1016_s17, 192  ;;  %s1233_s30 = scalar_lea.hbm %s1708_s3, 384 }
 0x190   : > { %p1230_p0 = scmp.ne.s32.totalorder %s1016_s17, %s1229_s28  ;;  %p1234_p1 = scmp.lt.s32.totalorder %s1016_s17, %s1708_s3 }
 0x191   : > { %p1235_p3 = scmp.lt.s32.totalorder %s1233_s30, %s1229_s28 }
 0x192   : > { %p1231_p2 = pnand %p1230_p0, %p1717_p12 }
 0x193   : > { %p1236_p6 = por %p1235_p3, %p1234_p1 }
 0x194   : > { %p1232_p9 = pneg %p1231_p2 }
 0x196   : > { %p1237_p11 = pnand %p1236_p6, %p1232_p9 }
 0x198   : > { %1240 = shalt.err (!%p1237_p11)
}
 0x199   : > { %1115 = dma.vmem_to_hbm [thread:$0]  (%p1717_p12), %s1019_s6, 192, %s1016_s17, %s1004_s22  }
 0x19a PF: > { %s1030_s10 = sand.u32 1, %s1267_s12   ;;  %p1718_p13 = scmp.ne.s32.totalorder %s1714_s25, 0 }
 0x19b   : > { %p1719_p4 = scmp.ge.s32.totalorder %s1279_s15, 2  ;;  %s1031_s11 = scalar_lea.sflag [#allocation5], %s1030_s10 }
 0x19d   : > { %p1122_p5 = pnand %p1719_p4, %p1718_p13 }
 0x19f   : > { %p1123_p7 = pneg %p1122_p5 }
 0x1a1   : > { %1262 = dma.done.wait (%p1123_p7), %s1031_s11, 192  }
 0x1a2   : > { %1264 = vsyncadd (%p1123_p7), %s1031_s11, 4294967104  ;;  %p16_p8 = scmp.ge.s32.totalorder %s1354_s18, 4   ;;  %s1720_s12 = smov %s1271_s13 }
 0x1a3   : > { %s1721_s13 = smov %s1275_s14  ;;  %s1722_s14 = smov %s1366_s21 }
 0x1a4   : > { %s1723_s15 = smov %s1354_s18  ;;  %18 = sbr.rel (!%p16_p8) target bundleno = 5 (0x5), region = 88 }
 0x1a9   :  { %1036 = vsyncpa [#allocation4], 1 }
 0x1aa   :  { %1038 = vsyncpa [#allocation4 + $0x1], 1 }
 0x1ab   :  { %1039 = vsyncpa [#allocation5], 1 }
 0x1ac   :  { %1041 = vsyncpa [#allocation5 + $0x1], 1 }

</bundles_post_ra>
